<compile_context>
chip_gen: v6e
topology: v6e:2x2x1
jax: 0.10.0
libtpu: 0.0.40
codegen_flags: <defaults>
</compile_context>

<pallas_src>
import functools

import jax
import jax.numpy as jnp
from jax.experimental import pallas as pl
from jax.experimental.pallas import tpu as pltpu


def _tree_detection_loss_kernel(res_pr_ref, res_gt_ref, obj_pr_ref, obj_gt_ref,
                                obj_w_ref, out_ref, *, pos_weight,
                                regression_weight, objectness_weight,
                                inv_res_elems, inv_obj_elems):
    # ---- regression loss: SmoothL1 (beta=1), summed over the block ----
    # Every item has the same element count, so sum-of-per-item-means is just
    # sum(all elements) * inv_res_elems (the /B happens outside).
    d = res_pr_ref[...].astype(jnp.float32) - res_gt_ref[...].astype(jnp.float32)
    ad = jnp.abs(d)
    sl1 = jnp.where(ad < 1.0, 0.5 * d * d, ad - 0.5)
    rloss_sum = jnp.sum(sl1) * inv_res_elems

    # ---- objectness: weighted BCEWithLogits(pos_weight), summed over the block ----
    x = obj_pr_ref[...].astype(jnp.float32)
    y = obj_gt_ref[...].astype(jnp.float32)
    w = obj_w_ref[...].astype(jnp.float32)
    # numerically stable softplus(-x) = max(-x, 0) + log1p(exp(-|x|))
    sp = jnp.maximum(-x, 0.0) + jnp.log1p(jnp.exp(-jnp.abs(x)))
    bce = (1.0 - y) * x + (1.0 + (pos_weight - 1.0) * y) * sp
    oloss_sum = jnp.sum(w * bce) * inv_obj_elems

    partial = objectness_weight * oloss_sum + regression_weight * rloss_sum
    # Per-block partial broadcast into a (1,8,128) VMEM tile (4 KiB writeback per
    # multi-MiB block -> negligible); only [0,0] is read outside.
    # TODO(synk): a (1,1) SMEM-space output would drop this writeback entirely.
    out_ref[...] = jnp.full(out_ref.shape, partial, dtype=out_ref.dtype)


def _default_target_block_bytes():
    """Per-generation input-block budget (pipeline double-buffers this)."""
    try:
        kind = jax.devices()[0].device_kind.lower()
    except Exception:
        return 8 * 1024 * 1024
    if "v5 lite" in kind or "v5e" in kind or "v5lite" in kind:
        return 6 * 1024 * 1024      # v5e: ~820 GB/s HBM, small scoped-VMEM default
    if "v6" in kind:
        return 10 * 1024 * 1024     # v6e: ~1.4 TB/s, 128 MiB VMEM
    if "v7" in kind or "7x" in kind:
        return 12 * 1024 * 1024     # v7x: ~3.2 TB/s, 64 MiB VMEM
    return 8 * 1024 * 1024


def tree_detection_loss(residual_pred, residual_gt, objectness_pred,
                        objectness_gt, objectness_weights, *,
                        regression_weight=1.0, objectness_weight=1.0,
                        objectness_pos_weight_factor=1.0,
                        lane_width=512,
                        target_block_bytes=None,
                        vmem_limit_bytes=48 * 1024 * 1024):
    B, N_pos, P = residual_pred.shape
    _, N_obj = objectness_pred.shape

    if target_block_bytes is None:
        target_block_bytes = _default_target_block_bytes()

    # pos_weight logic from the PyTorch forward (static: dense, equal-length items).
    N_neg = N_obj - N_pos
    pos_weight = (N_neg / N_pos) if N_pos != 0 else 0.0
    pos_weight = 1.0 if N_neg == 0 else pos_weight
    pos_weight *= objectness_pos_weight_factor

    # ---- lane-dense flattened layout (native dtype, cast to f32 in-kernel) ----
    res_pr = residual_pred.reshape(-1)
    res_gt = residual_gt.reshape(-1)
    obj_pr = objectness_pred.reshape(-1)
    obj_gt = objectness_gt.reshape(-1)
    obj_w = objectness_weights.reshape(-1)

    # Grid length: bound every step to ~target_block_bytes of input regardless
    # of N_obj/N_pos, and keep it even & >= 2 so the "parallel" grid axis shards
    # evenly across v7x's two TensorCores.
    total_bytes = (2 * res_pr.size * jnp.dtype(res_pr.dtype).itemsize
                   + 3 * obj_pr.size * jnp.dtype(obj_pr.dtype).itemsize)
    num_blocks = max(2, pl.cdiv(int(total_bytes), int(target_block_bytes)))
    num_blocks += num_blocks % 2

    def _group_to_rows(arrs):
        # Rows per block rounded to the packed-sublane multiple of the widest
        # packing in the group (8 rows f32, 16 bf16, 32 int8/fp8).
        pack = max(max(8, 32 // jnp.dtype(a.dtype).itemsize) for a in arrs)
        rows = pl.cdiv(max(arrs[0].size, 1), lane_width)
        rows_pb = pl.cdiv(rows, num_blocks)
        rows_pb = pl.cdiv(rows_pb, pack) * pack
        padded = rows_pb * num_blocks * lane_width
        out = [jnp.pad(a, (0, padded - a.size)).reshape(rows_pb * num_blocks,
                                                        lane_width)
               for a in arrs]
        return out, rows_pb

    # Zero padding contributes exactly 0 to both terms:
    #   SmoothL1(0,0)=0 and obj_w=0 kills the padded BCE contribution.
    (res_pr, res_gt), res_rows = _group_to_rows([res_pr, res_gt])
    (obj_pr, obj_gt, obj_w), obj_rows = _group_to_rows([obj_pr, obj_gt, obj_w])

    kernel = functools.partial(
        _tree_detection_loss_kernel,
        pos_weight=float(pos_weight),
        regression_weight=float(regression_weight),
        objectness_weight=float(objectness_weight),
        inv_res_elems=1.0 / float(N_pos * P),
        inv_obj_elems=1.0 / float(N_obj),
    )

    partials = pl.pallas_call(
        kernel,
        out_shape=jax.ShapeDtypeStruct((num_blocks, 8, 128), jnp.float32),
        grid=(num_blocks,),
        in_specs=[
            pl.BlockSpec((res_rows, lane_width), lambda b: (b, 0)),
            pl.BlockSpec((res_rows, lane_width), lambda b: (b, 0)),
            pl.BlockSpec((obj_rows, lane_width), lambda b: (b, 0)),
            pl.BlockSpec((obj_rows, lane_width), lambda b: (b, 0)),
            pl.BlockSpec((obj_rows, lane_width), lambda b: (b, 0)),
        ],
        out_specs=pl.BlockSpec((1, 8, 128), lambda b: (b, 0, 0)),
        compiler_params=pltpu.CompilerParams(
            dimension_semantics=("parallel",),
            vmem_limit_bytes=int(vmem_limit_bytes)),
    )(res_pr, res_gt, obj_pr, obj_gt, obj_w)

    # loss_sum / loss_n : mean over original batch items (padding added exactly 0)
    return jnp.sum(partials[:, 0, 0]) / B


def _reference_loss(res_pr, res_gt, obj_pr, obj_gt, obj_w, pos_weight):
    """Pure-JAX reference mirroring the PyTorch forward (default config)."""
    d = res_pr - res_gt
    ad = jnp.abs(d)
    sl1 = jnp.where(ad < 1.0, 0.5 * d * d, ad - 0.5)
    rloss = jnp.mean(sl1, axis=(1, 2))                     # per item

    x, y = obj_pr, obj_gt
    sp = jnp.maximum(-x, 0.0) + jnp.log1p(jnp.exp(-jnp.abs(x)))
    bce = (1.0 - y) * x + (1.0 + (pos_weight - 1.0) * y) * sp
    oloss = jnp.mean(obj_w * bce, axis=1)                  # per item

    return jnp.mean(oloss + rloss)


if __name__ == "__main__":
    B, N_pos, P, N_OBJ = 2, 8, 4, 64

    key = jax.random.PRNGKey(0)
    k1, k2, k3, k4 = jax.random.split(key, 4)

    residual_pred = jax.random.normal(k1, (B, N_pos, P), dtype=jnp.float32)
    residual_gt = jax.random.normal(k2, (B, N_pos, P), dtype=jnp.float32) * 2.0
    objectness_pred = jax.random.normal(k3, (B, N_OBJ), dtype=jnp.float32) * 3.0
    # first N_pos anchors are positives
    objectness_gt = jnp.concatenate(
        [jnp.ones((B, N_pos), jnp.float32), jnp.zeros((B, N_OBJ - N_pos), jnp.float32)],
        axis=1)
    objectness_weights = jax.random.uniform(k4, (B, N_OBJ), dtype=jnp.float32,
                                            minval=0.5, maxval=1.5)

    loss = tree_detection_loss(residual_pred, residual_gt, objectness_pred,
                               objectness_gt, objectness_weights)
    loss = jax.block_until_ready(loss)

    pos_weight = (N_OBJ - N_pos) / N_pos
    ref = _reference_loss(residual_pred, residual_gt, objectness_pred,
                          objectness_gt, objectness_weights, pos_weight)
    ref = jax.block_until_ready(ref)

    assert jnp.allclose(loss, ref, rtol=1e-5, atol=1e-5), (loss, ref)
    print("KERNEL_OK")
</pallas_src>

<mosaic_0001>
module attributes {stable_mosaic.version = 11 : i64} {
  func.func @_tree_detection_loss_kernel(%arg0: i32, %arg1: memref<8x512xf32, #tpu.memory_space<vmem>>, %arg2: memref<8x512xf32, #tpu.memory_space<vmem>>, %arg3: memref<8x512xf32, #tpu.memory_space<vmem>>, %arg4: memref<8x512xf32, #tpu.memory_space<vmem>>, %arg5: memref<8x512xf32, #tpu.memory_space<vmem>>, %arg6: memref<1x8x128xf32, #tpu.memory_space<vmem>>) attributes {dimension_semantics = [#tpu.dimension_semantics<parallel>], iteration_bounds = array<i64: 2>, scalar_prefetch = 0 : i64, scratch_operands = 0 : i64, tpu.core_type = #tpu.core_type<tc>, window_params = [{transform_indices = @transform_0, window_bounds = array<i64: 8, 512>}, {transform_indices = @transform_1, window_bounds = array<i64: 8, 512>}, {transform_indices = @transform_2, window_bounds = array<i64: 8, 512>}, {transform_indices = @transform_3, window_bounds = array<i64: 8, 512>}, {transform_indices = @transform_4, window_bounds = array<i64: 8, 512>}, {transform_indices = @transform_5, window_bounds = array<i64: 1, 8, 128>}]} {
    %c0 = arith.constant 0 : index
    %c0_0 = arith.constant 0 : index
    %0 = vector.load %arg1[%c0, %c0_0] : memref<8x512xf32, #tpu.memory_space<vmem>>, vector<8x512xf32>
    %c0_1 = arith.constant 0 : index
    %c0_2 = arith.constant 0 : index
    %1 = vector.load %arg2[%c0_1, %c0_2] : memref<8x512xf32, #tpu.memory_space<vmem>>, vector<8x512xf32>
    %2 = arith.subf %0, %1 : vector<8x512xf32>
    %3 = math.absf %2 : vector<8x512xf32>
    %cst = arith.constant 1.000000e+00 : f32
    %4 = vector.broadcast %cst : f32 to vector<8x512xf32>
    %5 = arith.cmpf olt, %3, %4 : vector<8x512xf32>
    %cst_3 = arith.constant 5.000000e-01 : f32
    %6 = vector.broadcast %cst_3 : f32 to vector<8x512xf32>
    %7 = arith.mulf %6, %2 : vector<8x512xf32>
    %8 = arith.mulf %7, %2 : vector<8x512xf32>
    %cst_4 = arith.constant 5.000000e-01 : f32
    %9 = vector.broadcast %cst_4 : f32 to vector<8x512xf32>
    %10 = arith.subf %3, %9 : vector<8x512xf32>
    %11 = arith.select %5, %8, %10 : vector<8x512xi1>, vector<8x512xf32>
    %12 = vector.shape_cast %11 : vector<8x512xf32> to vector<1x8x512xf32>
    %cst_5 = arith.constant dense<0.000000e+00> : vector<1xf32>
    %13 = vector.multi_reduction <add>, %12, %cst_5 [1, 2] : vector<1x8x512xf32> to vector<1xf32>
    %14 = vector.shape_cast %13 : vector<1xf32> to vector<1x1x1xf32>
    %15 = vector.extract %14[0, 0, 0] : f32 from vector<1x1x1xf32>
    %cst_6 = arith.constant 3.125000e-02 : f32
    %16 = arith.mulf %15, %cst_6 : f32
    %c0_7 = arith.constant 0 : index
    %c0_8 = arith.constant 0 : index
    %17 = vector.load %arg3[%c0_7, %c0_8] : memref<8x512xf32, #tpu.memory_space<vmem>>, vector<8x512xf32>
    %c0_9 = arith.constant 0 : index
    %c0_10 = arith.constant 0 : index
    %18 = vector.load %arg4[%c0_9, %c0_10] : memref<8x512xf32, #tpu.memory_space<vmem>>, vector<8x512xf32>
    %c0_11 = arith.constant 0 : index
    %c0_12 = arith.constant 0 : index
    %19 = vector.load %arg5[%c0_11, %c0_12] : memref<8x512xf32, #tpu.memory_space<vmem>>, vector<8x512xf32>
    %cst_13 = arith.constant 0.000000e+00 : f32
    %20 = vector.broadcast %cst_13 : f32 to vector<8x512xf32>
    %21 = arith.subf %20, %17 : vector<8x512xf32>
    %cst_14 = arith.constant 0.000000e+00 : f32
    %22 = vector.broadcast %cst_14 : f32 to vector<8x512xf32>
    %23 = arith.maximumf %21, %22 : vector<8x512xf32>
    %24 = math.absf %17 : vector<8x512xf32>
    %cst_15 = arith.constant 0.000000e+00 : f32
    %25 = vector.broadcast %cst_15 : f32 to vector<8x512xf32>
    %26 = arith.subf %25, %24 : vector<8x512xf32>
    %27 = math.exp %26 : vector<8x512xf32>
    %28 = math.log1p %27 : vector<8x512xf32>
    %29 = arith.addf %23, %28 : vector<8x512xf32>
    %cst_16 = arith.constant 1.000000e+00 : f32
    %30 = vector.broadcast %cst_16 : f32 to vector<8x512xf32>
    %31 = arith.subf %30, %18 : vector<8x512xf32>
    %32 = arith.mulf %31, %17 : vector<8x512xf32>
    %cst_17 = arith.constant 6.000000e+00 : f32
    %33 = vector.broadcast %cst_17 : f32 to vector<8x512xf32>
    %34 = arith.mulf %33, %18 : vector<8x512xf32>
    %cst_18 = arith.constant 1.000000e+00 : f32
    %35 = vector.broadcast %cst_18 : f32 to vector<8x512xf32>
    %36 = arith.addf %35, %34 : vector<8x512xf32>
    %37 = arith.mulf %36, %29 : vector<8x512xf32>
    %38 = arith.addf %32, %37 : vector<8x512xf32>
    %39 = arith.mulf %19, %38 : vector<8x512xf32>
    %40 = vector.shape_cast %39 : vector<8x512xf32> to vector<1x8x512xf32>
    %cst_19 = arith.constant dense<0.000000e+00> : vector<1xf32>
    %41 = vector.multi_reduction <add>, %40, %cst_19 [1, 2] : vector<1x8x512xf32> to vector<1xf32>
    %42 = vector.shape_cast %41 : vector<1xf32> to vector<1x1x1xf32>
    %43 = vector.extract %42[0, 0, 0] : f32 from vector<1x1x1xf32>
    %cst_20 = arith.constant 1.562500e-02 : f32
    %44 = arith.mulf %43, %cst_20 : f32
    %cst_21 = arith.constant 1.000000e+00 : f32
    %45 = arith.mulf %cst_21, %44 : f32
    %cst_22 = arith.constant 1.000000e+00 : f32
    %46 = arith.mulf %cst_22, %16 : f32
    %47 = arith.addf %45, %46 : f32
    %48 = vector.broadcast %47 : f32 to vector<1x8x128xf32>
    %c0_23 = arith.constant 0 : index
    %c0_24 = arith.constant 0 : index
    %c0_25 = arith.constant 0 : index
    %49 = vector.load %arg6[%c0_23, %c0_24, %c0_25] : memref<1x8x128xf32, #tpu.memory_space<vmem>>, vector<1x8x128xf32>
    tpu.vector_store %arg6[%c0_23, %c0_24, %c0_25], %48 {strides = array<i32>} : memref<1x8x128xf32, #tpu.memory_space<vmem>>, vector<1x8x128xf32>,
    return
  }
  func.func @transform_0(%arg0: i32) -> (i32, i32) {
    %c0_i32 = arith.constant 0 : i32
    %c0_i32_0 = arith.constant 0 : i32
    return %arg0, %c0_i32 : i32, i32
  }
  func.func @transform_1(%arg0: i32) -> (i32, i32) {
    %c0_i32 = arith.constant 0 : i32
    %c0_i32_0 = arith.constant 0 : i32
    return %arg0, %c0_i32 : i32, i32
  }
  func.func @transform_2(%arg0: i32) -> (i32, i32) {
    %c0_i32 = arith.constant 0 : i32
    %c0_i32_0 = arith.constant 0 : i32
    return %arg0, %c0_i32 : i32, i32
  }
  func.func @transform_3(%arg0: i32) -> (i32, i32) {
    %c0_i32 = arith.constant 0 : i32
    %c0_i32_0 = arith.constant 0 : i32
    return %arg0, %c0_i32 : i32, i32
  }
  func.func @transform_4(%arg0: i32) -> (i32, i32) {
    %c0_i32 = arith.constant 0 : i32
    %c0_i32_0 = arith.constant 0 : i32
    return %arg0, %c0_i32 : i32, i32
  }
  func.func @transform_5(%arg0: i32) -> (i32, i32, i32) {
    %c0_i32 = arith.constant 0 : i32
    %c0_i32_0 = arith.constant 0 : i32
    %c0_i32_1 = arith.constant 0 : i32
    return %arg0, %c0_i32, %c0_i32_0 : i32, i32, i32
  }
}

</mosaic_0001>

<bundles_post_ra>
// kernel: tpu_custom_call.1
= control target key start
LH: loop header
LB: loop body
LE: loop exit
PB: predicated region body
PF: predicated region fallthrough
CT: control target
= control target key end

     0   :  { %s1459_s0 = inlined_call_operand.hbm [shape: f32[16,512], index: 0, kind: input, shape index: {}]   ;;  %s1460_s1 = inlined_call_operand.hbm [shape: f32[16,512], index: 1, kind: input, shape index: {}]   ;;  %s1461_s2 = inlined_call_operand.hbm [shape: f32[16,512], index: 2, kind: input, shape index: {}]   ;;  %s1462_s3 = inlined_call_operand.hbm [shape: f32[16,512], index: 3, kind: input, shape index: {}]   ;;  %s1463_s4 = inlined_call_operand.hbm [shape: f32[16,512], index: 4, kind: input, shape index: {}]   ;;  %s1464_s5 = inlined_call_operand.hbm [shape: f32[2,8,128], index: 5, kind: output, shape index: {}]  }
   0x1   :  { %1473 = sst [smem:[#allocation20_spill]] %s1459_s0 }
   0x2   :  { %1474 = sst [smem:[#allocation21_spill]] %s1460_s1 }
   0x3   :  { %1475 = sst [smem:[#allocation22_spill]] %s1462_s3 }
   0x4   :  { %10 = vsyncpa [#allocation3], 0 }
   0x5   :  { %12 = vsyncpa [#allocation3 + $0x1], 0 }
   0x6   :  { %13 = vsyncpa [#allocation6], 0 }
   0x7   :  { %15 = vsyncpa [#allocation6 + $0x1], 0 }
   0x8   :  { %16 = vsyncpa [#allocation9], 0 }
   0x9   :  { %18 = vsyncpa [#allocation9 + $0x1], 0 }
   0xa   :  { %19 = vsyncpa [#allocation4], 0 }
   0xb   :  { %21 = vsyncpa [#allocation4 + $0x1], 0  ;;  %s1100_s18 = smov 0   ;;  %s1102_s19 = smov 0  }
   0xc   :  { %s1104_s20 = smov 0   ;;  %s1106_s21 = smov 0  }
   0xd LB: > { %1476 = sst [smem:[#allocation16_spill]] %s1062_s21  ;;  %s1121_s22 = sadd.s32 4294967295, %s1062_s21   ;;  %s1062_s21 = sphi %s1106_s21, %s1515_s21   ;;  %s1058_s20 = sphi %s1104_s20, %s1519_s20   ;;  %s1054_s19 = sphi %s1102_s19, %s1518_s19   ;;  %s1050_s18 = sphi %s1100_s18, %s1517_s18  }
   0xe   : > { %s726_s23 = sadd.s32 4294967294, %s1062_s21   ;;  %s1125_s24 = sadd.s32 1, %s1062_s21  }
   0xf   : > { %1477 = sst [smem:[#allocation17_spill]] %s1125_s24  ;;  %s34_s25 = sadd.s32 1, %s1058_s20 }
  0x10   : > { %s31_s26 = ssub.s32 %s1062_s21, %s1125_s24  ;;  %p41_p0 = scmp.ne.s32.totalorder %s1058_s20, %s1054_s19 }
  0x11   : > { %p32_p1 = scmp.eq.s32.totalorder %s31_s26, 0  ;;  %p42_p2 = scmp.eq.s32.totalorder %s1062_s21, 0 }
  0x12   : > { %p47_p3 = scmp.ne.s32.totalorder %s1054_s19, %s1050_s18  ;;  %p48_p4 = scmp.eq.s32.totalorder %s1121_s22, 0 }
  0x13   : > { %s1137_s27 = scalar_select %p32_p1, %s1058_s20, %s34_s25  }
  0x14   : > { %p43_p5 = por %p42_p2, %p41_p0  ;;  %p1139_p6 = por %p48_p4, %p47_p3 }
  0x15   : > { %1478 = sst [smem:[#allocation18_spill]] %s1137_s27  ;;  %p175_p7 = scmp.eq.s32.totalorder %s1121_s22, 1 }
  0x16   : > { %s1479_s28 = scalar_select %p1139_p6, 1, 0 }
  0x17   : > { %p181_p8 = scmp.eq.s32.totalorder %s726_s23, 1  ;;  %p800_p10 = scmp.lt.s32.totalorder %s1062_s21, 2 }
  0x18   : > { %p1146_p11 = por %p175_p7, %p41_p0  ;;  %s1465_s6 = sand.u32 1, %s1058_s20  }
  0x19   : > { %p1150_p12 = por %p181_p8, %p47_p3  ;;  %s1156_s7 = sshll.u32 %s1062_s21, 9 }
  0x1a   : > { %s1480_s29 = scalar_select %p1146_p11, 1, 0 }
  0x1b   : > { %s1481_s30 = scalar_select %p1150_p12, 1, 0 }
  0x1c   : > { %s1160_s8 = sshll.u32 %s1465_s6, 5  ;;  %p1162_p13 = pnand %p800_p10, %p43_p5 }
  0x1d   : > { %1482 = sst [smem:[#allocation19_spill]] %s1481_s30  ;;  %s1466_s10 = sand.u32 1, %s1062_s21  }
  0x1e   : > { %s1484_s1 = sld [smem:[#allocation21_spill]]  ;;  %s224_s14 = scalar_lea.vmem [#allocation5], %s1160_s8 }
  0x1f   : > { %s232_s15 = sshll.u32 %s224_s14, 4  ;;  %s1177_s16 = scalar_lea.sflag [#allocation6], %s1466_s10  ;;  %s233_s15 = int_to_ptr.vmem [resolvable:$true] %s232_s15 }
  0x20   : > { %p1183_p2 = pneg %p1162_p13 }
  0x24   : > { %s1171_s13 = scalar_lea.hbm %s1484_s1, %s1156_s7  ;;  %s855_s11 = scalar_lea.hbm %s1484_s1, 1024 }
  0x25   : > { %s850_s17 = scalar_lea.hbm %s1171_s13, 512  ;;  %p856_p5 = scmp.lt.s32.totalorder %s1171_s13, %s1484_s1 }
  0x26   : > { %p851_p1 = scmp.ne.s32.totalorder %s1171_s13, %s850_s17  ;;  %p857_p7 = scmp.lt.s32.totalorder %s855_s11, %s850_s17 }
  0x28   : > { %p853_p3 = pnand %p1183_p2, %p851_p1  ;;  %p858_p8 = por %p857_p7, %p856_p5 }
  0x2a   : > { %p854_p4 = pneg %p853_p3 }
  0x2c   : > { %p859_p10 = pnand %p858_p8, %p854_p4 }
  0x2e   : > { %862 = shalt.err (!%p859_p10)
}
  0x2f   : > { %s863_s6 = scalar_lea.vmem %s233_s15, 512  ;;  %s1064_s10 = smov [#allocation5]  }
  0x30   : > { %p864_p9 = scmp.ne.s32.totalorder %s233_s15, %s863_s6  ;;  %s868_s27 = sshll.u32 %s1064_s10, 4  ;;  %s869_s27 = int_to_ptr.vmem [resolvable:$false] %s868_s27 }
  0x31   : > { %s870_s24 = scalar_lea.vmem %s869_s27, 1024  ;;  %p871_p1 = scmp.lt.s32.totalorder %s233_s15, %s869_s27 }
  0x32   : > { %p866_p0 = pnand %p864_p9, %p1183_p2  ;;  %p872_p3 = scmp.lt.s32.totalorder %s870_s24, %s863_s6 }
  0x34   : > { %p867_p12 = pneg %p866_p0  ;;  %p873_p11 = por %p872_p3, %p871_p1 }
  0x36   : > { %p874_p6 = pnand %p873_p11, %p867_p12 }
  0x38   : > { %877 = shalt.err (!%p874_p6)
}
  0x39   : > { %786 = dma.hbm_to_vmem [thread:$0]  (!%p1162_p13), %s1171_s13, 512, %s233_s15, %s1177_s16  }
  0x3a   : > { %p294_p9 = scmp.lt.s32.totalorder %s1062_s21, 3  ;;  %s1486_s3 = sld [smem:[#allocation22_spill]] }
  0x3b   : > { %p1487_p0 = scmp.ge.s32.totalorder %s1062_s21, 1  ;;  %s262_s6 = scalar_lea.vmem [#allocation8], %s1160_s8 }
  0x3c   : > { %s270_s25 = sshll.u32 %s262_s6, 4  ;;  %s1489_s26 = sand.u32 1, %s1062_s21   ;;  %s271_s25 = int_to_ptr.vmem [resolvable:$true] %s270_s25 }
  0x3d   : > { %p1211_p6 = pnand %p1487_p0, %p294_p9  ;;  %s1218_s11 = scalar_lea.sflag [#allocation9], %s1489_s26 }
  0x3f   : > { %s1488_s24 = scalar_select %p1211_p6, 1, 0 }
  0x40   : > { %s1207_s27 = scalar_lea.hbm %s1486_s3, %s1156_s7  ;;  %s883_s14 = scalar_lea.hbm %s1486_s3, 1024 }
  0x41   : > { %s878_s13 = scalar_lea.hbm %s1207_s27, 512  ;;  %p884_p5 = scmp.lt.s32.totalorder %s1207_s27, %s1486_s3 }
  0x42   : > { %p879_p11 = scmp.ne.s32.totalorder %s1207_s27, %s878_s13  ;;  %p885_p7 = scmp.lt.s32.totalorder %s883_s14, %s878_s13 }
  0x44   : > { %p881_p12 = pnand %p879_p11, %p1183_p2  ;;  %p886_p8 = por %p885_p7, %p884_p5 }
  0x46   : > { %p882_p4 = pneg %p881_p12 }
  0x48   : > { %p887_p10 = pnand %p886_p8, %p882_p4 }
  0x4a   : > { %890 = shalt.err (!%p887_p10)
}
  0x4b   : > { %s891_s6 = scalar_lea.vmem %s271_s25, 512  ;;  %s1065_s26 = smov [#allocation8]  }
  0x4c   : > { %p892_p1 = scmp.ne.s32.totalorder %s271_s25, %s891_s6  ;;  %s896_s1 = sshll.u32 %s1065_s26, 4  ;;  %s897_s1 = int_to_ptr.vmem [resolvable:$false] %s896_s1 }
  0x4d   : > { %s898_s21 = scalar_lea.vmem %s897_s1, 1024  ;;  %p899_p0 = scmp.lt.s32.totalorder %s271_s25, %s897_s1 }
  0x4e   : > { %p894_p3 = pnand %p892_p1, %p1183_p2  ;;  %p900_p11 = scmp.lt.s32.totalorder %s898_s21, %s891_s6 }
  0x50   : > { %p895_p9 = pneg %p894_p3  ;;  %p901_p12 = por %p900_p11, %p899_p0 }
  0x52   : > { %p902_p6 = pnand %p901_p12, %p895_p9 }
  0x54   : > { %905 = shalt.err (!%p902_p6)
}
  0x55   : > { %792 = dma.hbm_to_vmem [thread:$0]  (!%p1162_p13), %s1207_s27, 512, %s271_s25, %s1218_s11  }
  0x56   : > { %s1490_s0 = sld [smem:[#allocation20_spill]]  ;;  %s205_s1 = scalar_lea.vmem [#allocation2], %s1160_s8 }
  0x57   : > { %s213_s21 = sshll.u32 %s205_s1, 4  ;;  %s1248_s17 = scalar_lea.hbm %s1461_s2, %s1156_s7  ;;  %s214_s21 = int_to_ptr.vmem [resolvable:$true] %s213_s21 }
  0x58   : > { %s1491_s6 = sand.u32 1, %s1058_s20  }
  0x59   : > { %s202_s26 = scalar_lea.sflag [#allocation3], %s1491_s6 }
  0x5c   : > { %s1241_s12 = scalar_lea.hbm %s1490_s0, %s1156_s7  ;;  %s911_s13 = scalar_lea.hbm %s1490_s0, 1024 }
  0x5d   : > { %s906_s3 = scalar_lea.hbm %s1241_s12, 512  ;;  %p912_p7 = scmp.lt.s32.totalorder %s1241_s12, %s1490_s0 }
  0x5e   : > { %p907_p6 = scmp.ne.s32.totalorder %s1241_s12, %s906_s3  ;;  %p913_p8 = scmp.lt.s32.totalorder %s911_s13, %s906_s3 }
  0x60   : > { %p909_p4 = pnand %p907_p6, %p1183_p2  ;;  %p914_p10 = por %p913_p8, %p912_p7 }
  0x62   : > { %p910_p5 = pneg %p909_p4 }
  0x64   : > { %p915_p1 = pnand %p914_p10, %p910_p5 }
  0x66   : > { %918 = shalt.err (!%p915_p1)
}
  0x67   : > { %s919_s1 = scalar_lea.vmem %s214_s21, 512  ;;  %s1066_s14 = smov [#allocation2]  }
  0x68   : > { %p920_p3 = scmp.ne.s32.totalorder %s214_s21, %s919_s1  ;;  %s924_s10 = sshll.u32 %s1066_s14, 4  ;;  %s925_s10 = int_to_ptr.vmem [resolvable:$false] %s924_s10 }
  0x69   : > { %s926_s6 = scalar_lea.vmem %s925_s10, 1024  ;;  %p927_p11 = scmp.lt.s32.totalorder %s214_s21, %s925_s10 }
  0x6a   : > { %p922_p9 = pnand %p920_p3, %p1183_p2  ;;  %p928_p12 = scmp.lt.s32.totalorder %s926_s6, %s919_s1 }
  0x6c   : > { %p923_p0 = pneg %p922_p9  ;;  %p929_p6 = por %p928_p12, %p927_p11 }
  0x6e   : > { %p930_p4 = pnand %p929_p6, %p923_p0 }
  0x70   : > { %933 = shalt.err (!%p930_p4)
}
  0x71   : > { %783 = dma.hbm_to_vmem [thread:$0]  (!%p1162_p13), %s1241_s12, 512, %s214_s21, %s202_s26  }
  0x72   : > { %s243_s3 = scalar_lea.vmem [#allocation7], %s1160_s8  ;;  %s1273_s13 = scalar_lea.hbm %s1463_s4, %s1156_s7 }
  0x73   : > { %s251_s30 = sshll.u32 %s243_s3, 4  ;;  %s934_s15 = scalar_lea.hbm %s1248_s17, 512  ;;  %s252_s30 = int_to_ptr.vmem [resolvable:$true] %s251_s30 }
  0x74   : > { %p935_p5 = scmp.ne.s32.totalorder %s1248_s17, %s934_s15  ;;  %s939_s10 = scalar_lea.hbm %s1461_s2, 1024 }
  0x75   : > { %p940_p10 = scmp.lt.s32.totalorder %s1248_s17, %s1461_s2  ;;  %p941_p1 = scmp.lt.s32.totalorder %s939_s10, %s934_s15 }
  0x76   : > { %p937_p7 = pnand %p935_p5, %p1183_p2 }
  0x77   : > { %p942_p3 = por %p941_p1, %p940_p10 }
  0x78   : > { %p938_p8 = pneg %p937_p7 }
  0x7a   : > { %p943_p9 = pnand %p942_p3, %p938_p8 }
  0x7c   : > { %946 = shalt.err (!%p943_p9)
}
  0x7d   : > { %s947_s12 = scalar_lea.vmem %s252_s30, 512  ;;  %s1067_s7 = smov [#allocation7]  }
  0x7e   : > { %p948_p0 = scmp.ne.s32.totalorder %s252_s30, %s947_s12  ;;  %s952_s21 = sshll.u32 %s1067_s7, 4  ;;  %s953_s21 = int_to_ptr.vmem [resolvable:$false] %s952_s21 }
  0x7f   : > { %s954_s26 = scalar_lea.vmem %s953_s21, 1024  ;;  %p955_p6 = scmp.lt.s32.totalorder %s252_s30, %s953_s21 }
  0x80   : > { %p950_p11 = pnand %p948_p0, %p1183_p2  ;;  %p956_p4 = scmp.lt.s32.totalorder %s954_s26, %s947_s12 }
  0x82   : > { %p951_p12 = pneg %p950_p11  ;;  %p957_p5 = por %p956_p4, %p955_p6 }
  0x84   : > { %p958_p7 = pnand %p957_p5, %p951_p12 }
  0x86   : > { %961 = shalt.err (!%p958_p7)
}
  0x87   : > { %789 = dma.hbm_to_vmem [thread:$0]  (!%p1162_p13), %s1248_s17, 512, %s252_s30, %s1177_s16  }
  0x88   : > { %s281_s0 = scalar_lea.vmem [#allocation10], %s1160_s8  ;;  %s962_s27 = scalar_lea.hbm %s1273_s13, 512 }
  0x89   : > { %s289_s3 = sshll.u32 %s281_s0, 4  ;;  %p963_p8 = scmp.ne.s32.totalorder %s1273_s13, %s962_s27  ;;  %s290_s3 = int_to_ptr.vmem [resolvable:$true] %s289_s3 }
  0x8a   : > { %s967_s1 = scalar_lea.hbm %s1463_s4, 1024  ;;  %p968_p3 = scmp.lt.s32.totalorder %s1273_s13, %s1463_s4 }
  0x8b   : > { %p965_p10 = pnand %p963_p8, %p1183_p2  ;;  %p969_p9 = scmp.lt.s32.totalorder %s967_s1, %s962_s27 }
  0x8d   : > { %p966_p1 = pneg %p965_p10  ;;  %p970_p0 = por %p969_p9, %p968_p3 }
  0x8f   : > { %p971_p11 = pnand %p970_p0, %p966_p1 }
  0x91   : > { %974 = shalt.err (!%p971_p11)
}
  0x92   : > { %s975_s8 = scalar_lea.vmem %s290_s3, 512  ;;  %s1068_s16 = smov [#allocation10]  }
  0x93   : > { %p976_p12 = scmp.ne.s32.totalorder %s290_s3, %s975_s8  ;;  %s980_s17 = sshll.u32 %s1068_s16, 4  ;;  %s981_s17 = int_to_ptr.vmem [resolvable:$false] %s980_s17 }
  0x94   : > { %s982_s30 = scalar_lea.vmem %s981_s17, 1024  ;;  %p983_p5 = scmp.lt.s32.totalorder %s290_s3, %s981_s17 }
  0x95   : > { %p978_p6 = pnand %p976_p12, %p1183_p2  ;;  %p984_p7 = scmp.lt.s32.totalorder %s982_s30, %s975_s8 }
  0x97   : > { %p979_p4 = pneg %p978_p6  ;;  %p985_p8 = por %p984_p7, %p983_p5 }
  0x99   : > { %p986_p10 = pnand %p985_p8, %p979_p4 }
  0x9b   : > { %989 = shalt.err (!%p986_p10)
}
  0x9c   : > { %795 = dma.hbm_to_vmem [thread:$0]  (!%p1162_p13), %s1273_s13, 512, %s290_s3, %s1218_s11  }
  0x9d   : > { %p1492_p1 = scmp.ne.s32.totalorder %s1488_s24, 0 }
  0x9e   : > { %s1313_s23 = sand.u32 (!%p1492_p1), 1, %s1054_s19   ;;  %p1493_p2 = scmp.ne.s32.totalorder (!%p1492_p1), %s1479_s28, 0 }
  0x9f   : > { %298 = sbr.rel (%p1492_p1) target bundleno = 452 (0x1c4), region = 40  ;;  %s1316_s6 = sshll.u32 (!%p1492_p1), %s1313_s23, 5 }
  0xa0   : > { %s301_s12 = scalar_lea.sflag (!%p1492_p1), [#allocation3], %s1313_s23  ;;  %s304_s7 = scalar_lea.vmem (!%p1492_p1), [#allocation2], %s1316_s6 }
  0xa4   : > { %1033 = dma.done.wait (%p1493_p2), %s301_s12, 512  }
  0xa5   : > { %1035 = vsyncadd (%p1493_p2), %s301_s12, 4294966784  ;;  %s309_s9 = sand.u32 1, %s1121_s22   ;;  %s313_s11 = scalar_lea.vmem [#allocation5], %s1316_s6 }
  0xa6   : > { %s310_s24 = scalar_lea.sflag [#allocation6], %s309_s9 }
  0xa7   : > { %1037 = dma.done.wait (%p1493_p2), %s310_s24, 1024  }
  0xa8   : > { %1039 = vsyncadd (%p1493_p2), %s310_s24, 4294966272  ;;  %s1331_s13 = scalar_lea.vmem [#allocation7], %s1316_s6  ;;  %s328_s21 = scalar_lea.sflag [#allocation9], %s309_s9 }
  0xa9   : > { %s1334_s26 = scalar_lea.vmem [#allocation8], %s1316_s6 }
  0xaa   : > { %1041 = dma.done.wait (%p1493_p2), %s328_s21, 1024  }
  0xab   : > { %1043 = vsyncadd (%p1493_p2), %s328_s21, 4294966272  ;;  %v387_v0 = vld [vmem:[%s304_s7] sm:$0xff]  ;;  %v388_v1 = vld [vmem:[%s304_s7 + $0x8] sm:$0xff]  ;;  %s340_s28 = scalar_lea.vmem [#allocation10], %s1316_s6  ;;  %s750_s0 = sshll.u32 %s1313_s23, 3 }
  0xac   : > { %v389_v2 = vld [vmem:[%s304_s7 + $0x10] sm:$0xff]  ;;  %v390_v3 = vld [vmem:[%s304_s7 + $0x18] sm:$0xff]  ;;  %v391_v4 = vld [vmem:[%s313_s11] sm:$0xff]  ;;  %s756_s27 = sshll.u32 %s1121_s22, 7  ;;  %s386_s14 = scalar_lea.vmem [#allocation11], %s750_s0 }
  0xad   : > { %v392_v5 = vld [vmem:[%s313_s11 + $0x8] sm:$0xff]  ;;  %v393_v6 = vld [vmem:[%s313_s11 + $0x10] sm:$0xff]  ;;  %v394_v7 = vld [vmem:[%s313_s11 + $0x18] sm:$0xff]  ;;  %v395_v8 = vsub.f32 %v387_v0, %v391_v4  ;;  %s570_s10 = sshll.u32 %s386_s14, 4  ;;  %s1422_s30 = scalar_lea.hbm %s1464_s5, %s756_s27  ;;  %s571_s10 = int_to_ptr.vmem [resolvable:$true] %s570_s10 }
  0xae   : > { %v396_v9 = vsub.f32 %v388_v1, %v392_v5  ;;  %v397_v10 = vsub.f32 %v389_v2, %v393_v6  ;;  %v398_v11 = vsub.f32 %v390_v3, %v394_v7  ;;  %v1345_v23 = vld [vmem:[%s1331_s13] sm:$0xff]  ;;  %v1360_v33 = vld [vmem:[%s1331_s13 + $0x8] sm:$0xff]  ;;  %v1363_v34 = vld [vmem:[%s1331_s13 + $0x10] sm:$0xff]  ;;  %s557_s6 = scalar_lea.sflag [#allocation4], %s1313_s23  ;;  %s990_s12 = scalar_lea.vmem %s571_s10, 128 }
  0xaf   : > { %v399_v12 = vand.u32 2147483647, %v395_v8  ;;  %v407_v14 = vmul.f32 0.5, %v395_v8  ;;  %v1366_v35 = vld [vmem:[%s1331_s13 + $0x18] sm:$0xff]  ;;  %v456_v36 = vand.u32 2147483647, %v1345_v23  ;;  %p991_p13 = scmp.ne.s32.totalorder %s571_s10, %s990_s12 }
  0xb0   : > { %v400_v13 = vand.u32 2147483647, %v396_v9  ;;  %v408_v15 = vmul.f32 0.5, %v396_v9  ;;  %v401_v16 = vand.u32 2147483647, %v397_v10  ;;  %v409_v18 = vmul.f32 0.5, %v397_v10 }
  0xb1   : > { %v402_v17 = vand.u32 2147483647, %v398_v11  ;;  %v410_v19 = vmul.f32 0.5, %v398_v11  ;;  %vm1340_vm0 = vcmp.lt.f32.partialorder %v399_v12, 1.0  ;;  %v411_v21 = vmul.f32 %v407_v14, %v395_v8  ;;  %v440_v6 = vld [vmem:[%s1334_s26] sm:$0xff]  ;;  %v443_v20 = vld [vmem:[%s1334_s26 + $0x18] sm:$0xff] }
  0xb2   : > { %v412_v22 = vmul.f32 %v408_v15, %v396_v9  ;;  %vm1347_vm1 = vcmp.lt.f32.partialorder %v400_v13, 1.0  ;;  %vm1351_vm2 = vcmp.lt.f32.partialorder %v401_v16, 1.0  ;;  %v413_v26 = vmul.f32 %v409_v18, %v397_v10  ;;  %v441_v10 = vld [vmem:[%s1334_s26 + $0x8] sm:$0xff]  ;;  %v442_v15 = vld [vmem:[%s1334_s26 + $0x10] sm:$0xff]  ;;  %p1510_p3 = scmp.ne.s32.totalorder %s1480_s29, 0  ;;  %s1069_s22 = smov [#allocation11]  }
  0xb3   : > { %v414_v27 = vmul.f32 %v410_v19, %v398_v11  ;;  %v751_v28 = vadd.f32 -0.5, %v399_v12  ;;  %v752_v29 = vadd.f32 -0.5, %v400_v13  ;;  %v753_v30 = vadd.f32 -0.5, %v401_v16  ;;  %s994_s7 = sshll.u32 %s1069_s22, 4  ;;  %s995_s7 = int_to_ptr.vmem [resolvable:$false] %s994_s7 }
  0xb4   : > { %v754_v31 = vadd.f32 -0.5, %v402_v17  ;;  %vm1355_vm3 = vcmp.lt.f32.partialorder %v402_v17, 1.0  ;;  %v457_v42 = vand.u32 2147483647, %v1360_v33  ;;  %v458_v43 = vand.u32 2147483647, %v1363_v34  ;;  %p992_p9 = pnand %p991_p13, %p1510_p3  ;;  %p997_p11 = scmp.lt.s32.totalorder %s571_s10, %s995_s7 }
  0xb5   : > { %v419_v37 = vsel %vm1340_vm0, %v411_v21, %v751_v28  ;;  %v420_v38 = vsel %vm1347_vm1, %v412_v22, %v752_v29  ;;  %v421_v39 = vsel %vm1351_vm2, %v413_v26, %v753_v30  ;;  %v459_v44 = vand.u32 2147483647, %v1366_v35  ;;  %s996_s9 = scalar_lea.vmem %s995_s7, 256 }
  0xb6   : > { %v423_v40 = vadd.f32 %v420_v38, %v419_v37  ;;  %v422_v41 = vsel %vm1355_vm3, %v414_v27, %v754_v31  ;;  %v460_v46 = vsub.f32 0.0, %v456_v36  ;;  %v461_v47 = vsub.f32 0.0, %v457_v42  ;;  %p993_p0 = pneg %p992_p9  ;;  %p998_p12 = scmp.lt.s32.totalorder %s996_s9, %s990_s12 }
  0xb7   : > { %v462_v48 = vsub.f32 0.0, %v458_v43  ;;  %v463_v49 = vsub.f32 0.0, %v459_v44  ;;  %v448_v63 = vsub.f32 0.0, %v1345_v23  ;;  %v449_v1 = vsub.f32 0.0, %v1360_v33 }
  0xb8   : > { %v424_v45 = vadd.f32 %v423_v40, %v421_v39  ;;  %v464_v51 = vmul.f32 1.442695, %v460_v46  ;;  %v466_v52 = vmul.f32 1.442695, %v461_v47  ;;  %v450_v2 = vsub.f32 0.0, %v1363_v34  ;;  %p999_p6 = por %p998_p12, %p997_p11 }
  0xb9   : > { %v468_v53 = vmul.f32 1.442695, %v462_v48  ;;  %v470_v54 = vmul.f32 1.442695, %v463_v49  ;;  %v451_v4 = vsub.f32 0.0, %v1366_v35  ;;  %v452_v7 = vmax.f32 %v448_v63, 0.0 }
  0xba   : > { %v425_v50 = vadd.f32 %v424_v45, %v422_v41  ;;  %834 = vpow2.f32 %v464_v51  ;;  %v453_v11 = vmax.f32 %v449_v1, 0.0  ;;  %v454_v12 = vmax.f32 %v450_v2, 0.0  ;;  %p1000_p4 = pnand %p999_p6, %p993_p0 }
  0xbb   : > { %836 = vpow2.f32 %v466_v52  ;;  %v455_v16 = vmax.f32 %v451_v4, 0.0  ;;  %v512_v19 = vsub.f32 1.0, %v440_v6  ;;  %v513_v22 = vsub.f32 1.0, %v441_v10 }
  0xbc   : > { %426 = vadd.xlane.f32.xlu0 %v425_v50  ;;  %838 = vpow2.f32 %v468_v53  ;;  %v514_v24 = vsub.f32 1.0, %v442_v15  ;;  %v520_v25 = vmul.f32 6.0, %v440_v6  ;;  %v515_v28 = vsub.f32 1.0, %v443_v20 }
  0xbd   : > { %840 = vpow2.f32 %v470_v54  ;;  %v521_v29 = vmul.f32 6.0, %v441_v10  ;;  %v522_v37 = vmul.f32 6.0, %v442_v15  ;;  %v516_v42 = vmul.f32 %v512_v19, %v1345_v23 }
  0xbe   : > { %v523_v46 = vmul.f32 6.0, %v443_v20  ;;  %v524_v47 = vadd.f32 1.0, %v520_v25 }
  0xbf   : > { %v525_v51 = vadd.f32 1.0, %v521_v29 }
  0xc7   : > { %v835_v55 = vpop.eup %834 }
  0xc8   : > { %v837_v56 = vpop.eup %836  ;;  %v472_v57 = vadd.f32 1.0, %v835_v55  ;;  %v475_v0 = vmul.f32 -0.5, %v835_v55  ;;  %v478_v13 = vand.u32 2147483647, %v835_v55 }
  0xc9   : > { %v839_v58 = vpop.eup %838  ;;  %v481_v59 = vadd.f32 1.0, %v837_v56  ;;  %v484_v3 = vmul.f32 -0.5, %v837_v56  ;;  %v487_v17 = vand.u32 2147483647, %v837_v56 }
  0xca   : > { %v841_v60 = vpop.eup %840  ;;  %842 = vlog2.f32 %v472_v57  ;;  %v490_v61 = vadd.f32 1.0, %v839_v58  ;;  %v493_v5 = vmul.f32 -0.5, %v839_v58  ;;  %v476_v8 = vadd.f32 1.0, %v475_v0  ;;  %v444_v0 = vld [vmem:[%s340_s28] sm:$0xff] }
  0xcb   : > { %844 = vlog2.f32 %v481_v59  ;;  %v499_v62 = vadd.f32 1.0, %v841_v60  ;;  %v502_v9 = vmul.f32 -0.5, %v841_v60  ;;  %v485_v14 = vadd.f32 1.0, %v484_v3  ;;  %v445_v3 = vld [vmem:[%s340_s28 + $0x8] sm:$0xff] }
  0xcc   : > { %846 = vlog2.f32 %v490_v61  ;;  %v494_v18 = vadd.f32 1.0, %v493_v5  ;;  %v496_v21 = vand.u32 2147483647, %v839_v58  ;;  %v477_v26 = vmul.f32 %v835_v55, %v476_v8  ;;  %v446_v8 = vld [vmem:[%s340_s28 + $0x10] sm:$0xff] }
  0xcd   : > { %848 = vlog2.f32 %v499_v62  ;;  %v503_v27 = vadd.f32 1.0, %v502_v9  ;;  %vm1388_vm4 = vcmp.lt.f32.partialorder %v478_v13, 0.0004427343  ;;  %v486_v32 = vmul.f32 %v837_v56, %v485_v14 }
  0xce   : > { %v505_v36 = vand.u32 2147483647, %v841_v60  ;;  %vm1392_vm5 = vcmp.lt.f32.partialorder %v487_v17, 0.0004427343  ;;  %v495_v41 = vmul.f32 %v839_v58, %v494_v18  ;;  %vm1397_vm6 = vcmp.lt.f32.partialorder %v496_v21, 0.0004427343 }
  0xcf   : > { %v504_v50 = vmul.f32 %v841_v60, %v503_v27  ;;  %v526_v55 = vadd.f32 1.0, %v522_v37  ;;  %v517_v59 = vmul.f32 %v513_v22, %v1360_v33  ;;  %v518_v60 = vmul.f32 %v514_v24, %v1363_v34  ;;  %v447_v34 = vld [vmem:[%s340_s28 + $0x18] sm:$0xff] }
  0xd0   : > { %vm1405_vm7 = vcmp.lt.f32.partialorder %v505_v36, 0.0004427343  ;;  %v527_v62 = vadd.f32 1.0, %v523_v46  ;;  %v519_v5 = vmul.f32 %v515_v28, %v1366_v35 }
  0xd7   : > { %v843_v30 = vpop.eup %842 }
  0xd8   : > { %v845_v38 = vpop.eup %844  ;;  %v474_v39 = vmul.f32 0.6931472, %v843_v30 }
  0xd9   : > { %v847_v43 = vpop.eup %846  ;;  %v483_v44 = vmul.f32 0.6931472, %v845_v38 }
  0xda   : > { %v480_v48 = vsel %vm1388_vm4, %v477_v26, %v474_v39  ;;  %v492_v49 = vmul.f32 0.6931472, %v847_v43  ;;  %v849_v52 = vpop.eup %848 }
  0xdb   : > { %v489_v53 = vsel %vm1392_vm5, %v486_v32, %v483_v44  ;;  %v508_v54 = vadd.f32 %v480_v48, %v452_v7  ;;  %v501_v57 = vmul.f32 0.6931472, %v849_v52 }
  0xdc   : > { %v498_v56 = vsel %vm1397_vm6, %v495_v41, %v492_v49  ;;  %v509_v58 = vadd.f32 %v489_v53, %v453_v11 }
  0xdd   : > { %v510_v61 = vadd.f32 %v498_v56, %v454_v12  ;;  %v528_v63 = vmul.f32 %v524_v47, %v508_v54  ;;  %v507_v1 = vsel %vm1405_vm7, %v504_v50, %v501_v57 }
  0xde   : > { %v529_v2 = vmul.f32 %v525_v51, %v509_v58  ;;  %v511_v4 = vadd.f32 %v507_v1, %v455_v16 }
  0xdf   : > { %v530_v6 = vmul.f32 %v526_v55, %v510_v61  ;;  %v532_v7 = vadd.f32 %v528_v63, %v516_v42 }
  0xe0   : > { %v533_v9 = vadd.f32 %v529_v2, %v517_v59  ;;  %v531_v33 = vmul.f32 %v527_v62, %v511_v4 }
  0xe1   : > { %v534_v10 = vadd.f32 %v530_v6, %v518_v60  ;;  %v536_v11 = vmul.f32 %v532_v7, %v444_v0 }
  0xe2   : > { %v537_v12 = vmul.f32 %v533_v9, %v445_v3  ;;  %v535_v13 = vadd.f32 %v531_v33, %v519_v5 }
  0xe3   : > { %v538_v14 = vmul.f32 %v534_v10, %v446_v8 }
  0xe4   : > { %v540_v15 = vadd.f32 %v537_v12, %v536_v11  ;;  %v539_v17 = vmul.f32 %v535_v13, %v447_v34 }
  0xe6   : > { %v541_v18 = vadd.f32 %v540_v15, %v538_v14 }
  0xe8   : > { %v542_v19 = vadd.f32 %v541_v18, %v539_v17 }
  0xea   : > { %543 = vadd.xlane.f32.xlu0 %v542_v19 }
 0x145   : > { %v427_v20 = vpop.xlane.xlu0 %426 }
 0x146   : > { %v428_v16 = vrot.slane %v427_v20, 4 }
 0x148   : > { %v429_v35 = vadd.f32 %v428_v16, %v427_v20 }
 0x14a   : > { %v430_v21 = vrot.slane %v429_v35, 2 }
 0x14c   : > { %v431_v22 = vadd.f32 %v430_v21, %v429_v35 }
 0x14e   : > { %v432_v24 = vrot.slane %v431_v22, 1 }
 0x150   : > { %v433_v25 = vadd.f32 %v432_v24, %v431_v22 }
 0x152   : > { %764 = vpush %v433_v25 }
 0x173   : > { %v544_v26 = vpop.xlane.xlu0 %543 }
 0x174   : > { %v545_v27 = vrot.slane %v544_v26, 4 }
 0x176   : > { %v546_v28 = vadd.f32 %v545_v27, %v544_v26 }
 0x178   : > { %v547_v29 = vrot.slane %v546_v28, 2 }
 0x17a   : > { %v548_v30 = vadd.f32 %v547_v29, %v546_v28 }
 0x17c   : > { %v549_v31 = vrot.slane %v548_v30, 1 }
 0x17e   : > { %v550_v32 = vadd.f32 %v549_v31, %v548_v30 }
 0x180   : > { %766 = vpush %v550_v32 }
 0x183   : > { %s765_s3 = spop %764 }
 0x184   : > { %s435_s25 = smul.f32 0.03125, %s765_s3 }
 0x1b1   : > { %s767_s15 = spop %766 }
 0x1b2   : > { %s552_s1 = smul.f32 0.015625, %s767_s15 }
 0x1b4   : > { %s553_s8 = sadd.f32 %s552_s1, %s435_s25 }
 0x1b6   : > { %v554_v36 = vstv %s553_s8 }
 0x1b7   : > { %555 = vst [vmem:[%s386_s14] sm:$0xff] %v554_v36 }
 0x1b8   : > { %1003 = shalt.err (!%p1000_p4)
}
 0x1b9   : > { %s1004_s24 = scalar_lea.hbm %s1422_s30, 128  ;;  %s1008_s13 = scalar_lea.hbm %s1464_s5, 256 }
 0x1ba   : > { %p1005_p5 = scmp.ne.s32.totalorder %s1422_s30, %s1004_s24  ;;  %p1009_p10 = scmp.lt.s32.totalorder %s1422_s30, %s1464_s5 }
 0x1bb   : > { %p1010_p1 = scmp.lt.s32.totalorder %s1008_s13, %s1004_s24 }
 0x1bc   : > { %p1006_p7 = pnand %p1005_p5, %p1510_p3 }
 0x1bd   : > { %p1011_p2 = por %p1010_p1, %p1009_p10 }
 0x1be   : > { %p1007_p8 = pneg %p1006_p7 }
 0x1c0   : > { %p1012_p13 = pnand %p1011_p2, %p1007_p8 }
 0x1c2   : > { %1015 = shalt.err (!%p1012_p13)
}
 0x1c3   : > { %778 = dma.vmem_to_hbm [thread:$0]  (%p1510_p3), %s571_s10, 128, %s1422_s30, %s557_s6  }
 0x1c4 PF: > { %s1511_s28 = sld [smem:[#allocation19_spill]]  ;;  %s582_s3 = sand.u32 1, %s1050_s18  }
 0x1c5   : > { %s1512_s0 = sld [smem:[#allocation16_spill]]  ;;  %s583_s27 = scalar_lea.sflag [#allocation4], %s582_s3 }
 0x1ca   : > { %p1513_p9 = scmp.ne.s32.totalorder %s1511_s28, 0 }
 0x1cb   : > { %p1514_p0 = scmp.ge.s32.totalorder %s1512_s0, 2 }
 0x1cd   : > { %p797_p11 = pnand %p1514_p0, %p1513_p9 }
 0x1cf   : > { %p798_p12 = pneg %p797_p11 }
 0x1d1   : > { %1045 = dma.done.wait (%p798_p12), %s583_s27, 128  }
 0x1d2   : > { %1047 = vsyncadd (%p798_p12), %s583_s27, 4294967168  ;;  %s1515_s21 = sld [smem:[#allocation17_spill]]  ;;  %s1517_s18 = smov %s1054_s19 }
 0x1d3   : > { %s1516_s25 = sld [smem:[#allocation18_spill]]  ;;  %s1518_s19 = smov %s1058_s20 }
 0x1d8   : > { %p24_p6 = scmp.ge.s32.totalorder %s1515_s21, 4  }
 0x1d9   : > { %s1519_s20 = smov %s1516_s25 }
 0x1da   :  { %26 = sbr.rel (!%p24_p6) target bundleno = 13 (0xd), region = 133 }
 0x1df   :  { %588 = vsyncpa [#allocation3], 1 }
 0x1e0   :  { %590 = vsyncpa [#allocation3 + $0x1], 1 }
 0x1e1   :  { %591 = vsyncpa [#allocation6], 1 }
 0x1e2   :  { %593 = vsyncpa [#allocation6 + $0x1], 1 }
 0x1e3   :  { %594 = vsyncpa [#allocation9], 1 }
 0x1e4   :  { %596 = vsyncpa [#allocation9 + $0x1], 1 }
 0x1e5   :  { %597 = vsyncpa [#allocation4], 1 }
 0x1e6   :  { %599 = vsyncpa [#allocation4 + $0x1], 1 }

</bundles_post_ra>
